<compile_context>
chip_gen: v7x
topology: tpu7x:2x2x1
jax: 0.10.0
libtpu: 0.0.40
codegen_flags: <defaults>
</compile_context>

<pallas_src>
import jax
import jax.numpy as jnp
from jax.experimental import pallas as pl
from jax.experimental.pallas import tpu as pltpu

EPS = 0.001

# 1024 groups of (8, 128) = 4 MiB per f32 input block; 2 inputs x 2 pipeline
# buffers = 16 MiB, comfortably inside the 32 MiB scoped-VMEM limit requested
# below (and inside v7x's 64 MiB physical VMEM per TensorCore).
_MAX_TILE_GROUPS = 1024
_VMEM_LIMIT_BYTES = 32 * 1024 * 1024


def _dice_kernel(p_ref, t_ref, o_ref, inter_ref, sp_ref, st_ref):
    j = pl.program_id(1)

    @pl.when(j == 0)
    def _():
        inter_ref[...] = jnp.zeros_like(inter_ref)
        sp_ref[...] = jnp.zeros_like(sp_ref)
        st_ref[...] = jnp.zeros_like(st_ref)

    # Block shape (1, tile_groups, 8, 128); cast after load so bf16/f16 inputs
    # stream at reduced HBM bytes and are promoted to f32 on-chip.
    p = p_ref[...].astype(jnp.float32)
    t = t_ref[...].astype(jnp.float32)

    # Lane-wise accumulation: reduce only over the vreg-batch axes (pure VPU
    # adds); keep full (8, 128) accumulators so no cross-lane XLU reduction
    # runs in the hot loop.
    inter_ref[...] += jnp.sum(p * t, axis=(0, 1))
    sp_ref[...] += jnp.sum(p, axis=(0, 1))
    st_ref[...] += jnp.sum(t, axis=(0, 1))

    @pl.when(j == pl.num_programs(1) - 1)
    def _():
        # One cross-lane/sublane reduce per sample, then the dice score.
        inter = jnp.sum(inter_ref[...])
        sp = jnp.sum(sp_ref[...])
        st = jnp.sum(st_ref[...])
        score = (2.0 * inter + EPS) / (sp + st + EPS)
        # Lane-dense (8, 128) output block; wrapper reads element [i, 0, 0].
        o_ref[...] = jnp.zeros(o_ref.shape, jnp.float32) + score


def _per_sample_dice_scores(p2, t2):
    """p2, t2: (N, D) float arrays. Returns (N,) f32 per-sample dice scores."""
    n, d = p2.shape

    groups = pl.cdiv(d, 8 * 128)                     # number of (8,128) vreg groups
    n_chunks = pl.cdiv(groups, _MAX_TILE_GROUPS)     # grid steps along D
    tile_groups = pl.cdiv(groups, n_chunks)          # groups per block
    groups_pad = tile_groups * n_chunks
    d_pad = groups_pad * 8 * 128
    if d_pad != d:
        # Zero padding is exact: it adds nothing to any of the three sums.
        p2 = jnp.pad(p2, ((0, 0), (0, d_pad - d)))
        t2 = jnp.pad(t2, ((0, 0), (0, d_pad - d)))

    p4 = p2.reshape(n, groups_pad, 8, 128)
    t4 = t2.reshape(n, groups_pad, 8, 128)

    blk = (1, tile_groups, 8, 128)
    out = pl.pallas_call(
        _dice_kernel,
        out_shape=jax.ShapeDtypeStruct((n, 8, 128), jnp.float32),
        grid_spec=pltpu.PrefetchScalarGridSpec(
            num_scalar_prefetch=0,
            grid=(n, groups_pad // tile_groups),
            in_specs=[
                pl.BlockSpec(blk, lambda i, j: (i, j, 0, 0)),
                pl.BlockSpec(blk, lambda i, j: (i, j, 0, 0)),
            ],
            out_specs=pl.BlockSpec((1, 8, 128), lambda i, j: (i, 0, 0)),
            scratch_shapes=[
                pltpu.VMEM((8, 128), jnp.float32),
                pltpu.VMEM((8, 128), jnp.float32),
                pltpu.VMEM((8, 128), jnp.float32),
            ],
        ),
        compiler_params=pltpu.CompilerParams(
            dimension_semantics=("parallel", "arbitrary"),
            vmem_limit_bytes=_VMEM_LIMIT_BYTES,
        ),
    )(p4, t4)
    return out[:, 0, 0]


def _flatten(x):
    n = x.shape[0]
    x2 = x.reshape(n, -1)
    if not jnp.issubdtype(x2.dtype, jnp.floating):
        x2 = x2.astype(jnp.float32)  # bool / int masks -> f32
    return x2  # float inputs (f32 / bf16 / f16) stream in their native dtype


@jax.jit
def dice_scores_pallas(preds, trues):
    return _per_sample_dice_scores(_flatten(preds), _flatten(trues))


@jax.jit
def dice_loss_pallas(preds, trues):
    n = preds.shape[0]
    scores = _per_sample_dice_scores(_flatten(preds), _flatten(trues))
    return jnp.clip(jnp.sum(scores) / n, 0.0, 1.0)


class DiceLossPallas:
    """Mirror of the torch DiceLoss module."""

    def __init__(self, weight=None, size_average=True):
        # TODO(synk): optional `weight` buffer rescale path not implemented
        # (module default registers weight=None).
        assert weight is None, "weight buffer not supported"
        self.weight = weight
        self.size_average = size_average

    def __call__(self, input, target):
        if self.size_average:
            return dice_loss_pallas(input, target)
        return dice_scores_pallas(input, target)


def _dice_ref(preds, trues):
    n = preds.shape[0]
    p = preds.reshape(n, -1).astype(jnp.float32)
    t = trues.reshape(n, -1).astype(jnp.float32)
    inter = jnp.sum(p * t, axis=1)
    scores = (2.0 * inter + EPS) / (jnp.sum(p, axis=1) + jnp.sum(t, axis=1) + EPS)
    return jnp.clip(jnp.sum(scores) / n, 0.0, 1.0)


if __name__ == "__main__":
    key = jax.random.PRNGKey(0)
    k1, k2 = jax.random.split(key)
    # NCHW: batch=2, channels=4, spatial=16x16  ->  D = 4*16*16 = 1024
    preds = jax.nn.sigmoid(jax.random.normal(k1, (2, 4, 16, 16), jnp.float32))
    trues = (jax.random.uniform(k2, (2, 4, 16, 16)) > 0.5).astype(jnp.float32)

    loss_module = DiceLossPallas()
    out = loss_module(preds, trues)
    jax.block_until_ready(out)

    ref = _dice_ref(preds, trues)
    assert jnp.allclose(out, ref, atol=1e-5, rtol=1e-5), (out, ref)
    print("KERNEL_OK")
</pallas_src>

<mosaic_0001>
module attributes {stable_mosaic.version = 11 : i64} {
  func.func @_dice_kernel(%arg0: i32, %arg1: i32, %arg2: memref<1x1x8x128xf32, #tpu.memory_space<vmem>>, %arg3: memref<1x1x8x128xf32, #tpu.memory_space<vmem>>, %arg4: memref<1x8x128xf32, #tpu.memory_space<vmem>>, %arg5: memref<8x128xf32, #tpu.memory_space<vmem>>, %arg6: memref<8x128xf32, #tpu.memory_space<vmem>>, %arg7: memref<8x128xf32, #tpu.memory_space<vmem>>) attributes {dimension_semantics = [#tpu.dimension_semantics<parallel>, #tpu.dimension_semantics<arbitrary>], iteration_bounds = array<i64: 2, 1>, scalar_prefetch = 0 : i64, scratch_operands = 3 : i64, tpu.core_type = #tpu.core_type<tc>, window_params = [{transform_indices = @transform_0, window_bounds = array<i64: 1, 1, 8, 128>}, {transform_indices = @transform_1, window_bounds = array<i64: 1, 1, 8, 128>}, {transform_indices = @transform_2, window_bounds = array<i64: 1, 8, 128>}]} {
    %c0_i32 = arith.constant 0 : i32
    %0 = arith.cmpi eq, %arg1, %c0_i32 : i32
    %1 = arith.extui %0 : i1 to i32
    %c0_i32_0 = arith.constant 0 : i32
    %2 = arith.cmpi ne, %1, %c0_i32_0 : i32
    scf.if %2 {
      %cst_24 = arith.constant 0.000000e+00 : f32
      %21 = vector.broadcast %cst_24 : f32 to vector<8x128xf32>
      %c0_25 = arith.constant 0 : index
      %c0_26 = arith.constant 0 : index
      %22 = vector.load %arg5[%c0_25, %c0_26] : memref<8x128xf32, #tpu.memory_space<vmem>>, vector<8x128xf32>
      tpu.vector_store %arg5[%c0_25, %c0_26], %21 {strides = array<i32>} : memref<8x128xf32, #tpu.memory_space<vmem>>, vector<8x128xf32>,
      %cst_27 = arith.constant 0.000000e+00 : f32
      %23 = vector.broadcast %cst_27 : f32 to vector<8x128xf32>
      %c0_28 = arith.constant 0 : index
      %c0_29 = arith.constant 0 : index
      %24 = vector.load %arg6[%c0_28, %c0_29] : memref<8x128xf32, #tpu.memory_space<vmem>>, vector<8x128xf32>
      tpu.vector_store %arg6[%c0_28, %c0_29], %23 {strides = array<i32>} : memref<8x128xf32, #tpu.memory_space<vmem>>, vector<8x128xf32>,
      %cst_30 = arith.constant 0.000000e+00 : f32
      %25 = vector.broadcast %cst_30 : f32 to vector<8x128xf32>
      %c0_31 = arith.constant 0 : index
      %c0_32 = arith.constant 0 : index
      %26 = vector.load %arg7[%c0_31, %c0_32] : memref<8x128xf32, #tpu.memory_space<vmem>>, vector<8x128xf32>
      tpu.vector_store %arg7[%c0_31, %c0_32], %25 {strides = array<i32>} : memref<8x128xf32, #tpu.memory_space<vmem>>, vector<8x128xf32>,
    } else {
    }
    %c0 = arith.constant 0 : index
    %c0_1 = arith.constant 0 : index
    %c0_2 = arith.constant 0 : index
    %c0_3 = arith.constant 0 : index
    %3 = vector.load %arg2[%c0, %c0_1, %c0_2, %c0_3] : memref<1x1x8x128xf32, #tpu.memory_space<vmem>>, vector<1x1x8x128xf32>
    %c0_4 = arith.constant 0 : index
    %c0_5 = arith.constant 0 : index
    %c0_6 = arith.constant 0 : index
    %c0_7 = arith.constant 0 : index
    %4 = vector.load %arg3[%c0_4, %c0_5, %c0_6, %c0_7] : memref<1x1x8x128xf32, #tpu.memory_space<vmem>>, vector<1x1x8x128xf32>
    %c0_8 = arith.constant 0 : index
    %c0_9 = arith.constant 0 : index
    %5 = vector.load %arg5[%c0_8, %c0_9] : memref<8x128xf32, #tpu.memory_space<vmem>>, vector<8x128xf32>
    %6 = arith.mulf %3, %4 : vector<1x1x8x128xf32>
    %cst = arith.constant dense<0.000000e+00> : vector<8x128xf32>
    %7 = vector.multi_reduction <add>, %6, %cst [0, 1] : vector<1x1x8x128xf32> to vector<8x128xf32>
    %8 = arith.addf %5, %7 : vector<8x128xf32>
    %c0_10 = arith.constant 0 : index
    %c0_11 = arith.constant 0 : index
    %9 = vector.load %arg5[%c0_10, %c0_11] : memref<8x128xf32, #tpu.memory_space<vmem>>, vector<8x128xf32>
    tpu.vector_store %arg5[%c0_10, %c0_11], %8 {strides = array<i32>} : memref<8x128xf32, #tpu.memory_space<vmem>>, vector<8x128xf32>,
    %c0_12 = arith.constant 0 : index
    %c0_13 = arith.constant 0 : index
    %10 = vector.load %arg6[%c0_12, %c0_13] : memref<8x128xf32, #tpu.memory_space<vmem>>, vector<8x128xf32>
    %cst_14 = arith.constant dense<0.000000e+00> : vector<8x128xf32>
    %11 = vector.multi_reduction <add>, %3, %cst_14 [0, 1] : vector<1x1x8x128xf32> to vector<8x128xf32>
    %12 = arith.addf %10, %11 : vector<8x128xf32>
    %c0_15 = arith.constant 0 : index
    %c0_16 = arith.constant 0 : index
    %13 = vector.load %arg6[%c0_15, %c0_16] : memref<8x128xf32, #tpu.memory_space<vmem>>, vector<8x128xf32>
    tpu.vector_store %arg6[%c0_15, %c0_16], %12 {strides = array<i32>} : memref<8x128xf32, #tpu.memory_space<vmem>>, vector<8x128xf32>,
    %c0_17 = arith.constant 0 : index
    %c0_18 = arith.constant 0 : index
    %14 = vector.load %arg7[%c0_17, %c0_18] : memref<8x128xf32, #tpu.memory_space<vmem>>, vector<8x128xf32>
    %cst_19 = arith.constant dense<0.000000e+00> : vector<8x128xf32>
    %15 = vector.multi_reduction <add>, %4, %cst_19 [0, 1] : vector<1x1x8x128xf32> to vector<8x128xf32>
    %16 = arith.addf %14, %15 : vector<8x128xf32>
    %c0_20 = arith.constant 0 : index
    %c0_21 = arith.constant 0 : index
    %17 = vector.load %arg7[%c0_20, %c0_21] : memref<8x128xf32, #tpu.memory_space<vmem>>, vector<8x128xf32>
    tpu.vector_store %arg7[%c0_20, %c0_21], %16 {strides = array<i32>} : memref<8x128xf32, #tpu.memory_space<vmem>>, vector<8x128xf32>,
    %c0_i32_22 = arith.constant 0 : i32
    %18 = arith.cmpi eq, %arg1, %c0_i32_22 : i32
    %19 = arith.extui %18 : i1 to i32
    %c0_i32_23 = arith.constant 0 : i32
    %20 = arith.cmpi ne, %19, %c0_i32_23 : i32
    scf.if %20 {
      %c0_24 = arith.constant 0 : index
      %c0_25 = arith.constant 0 : index
      %21 = vector.load %arg5[%c0_24, %c0_25] : memref<8x128xf32, #tpu.memory_space<vmem>>, vector<8x128xf32>
      %22 = vector.shape_cast %21 : vector<8x128xf32> to vector<1x8x128xf32>
      %cst_26 = arith.constant dense<0.000000e+00> : vector<1xf32>
      %23 = vector.multi_reduction <add>, %22, %cst_26 [1, 2] : vector<1x8x128xf32> to vector<1xf32>
      %24 = vector.shape_cast %23 : vector<1xf32> to vector<1x1x1xf32>
      %25 = vector.extract %24[0, 0, 0] : f32 from vector<1x1x1xf32>
      %c0_27 = arith.constant 0 : index
      %c0_28 = arith.constant 0 : index
      %26 = vector.load %arg6[%c0_27, %c0_28] : memref<8x128xf32, #tpu.memory_space<vmem>>, vector<8x128xf32>
      %27 = vector.shape_cast %26 : vector<8x128xf32> to vector<1x8x128xf32>
      %cst_29 = arith.constant dense<0.000000e+00> : vector<1xf32>
      %28 = vector.multi_reduction <add>, %27, %cst_29 [1, 2] : vector<1x8x128xf32> to vector<1xf32>
      %29 = vector.shape_cast %28 : vector<1xf32> to vector<1x1x1xf32>
      %30 = vector.extract %29[0, 0, 0] : f32 from vector<1x1x1xf32>
      %c0_30 = arith.constant 0 : index
      %c0_31 = arith.constant 0 : index
      %31 = vector.load %arg7[%c0_30, %c0_31] : memref<8x128xf32, #tpu.memory_space<vmem>>, vector<8x128xf32>
      %32 = vector.shape_cast %31 : vector<8x128xf32> to vector<1x8x128xf32>
      %cst_32 = arith.constant dense<0.000000e+00> : vector<1xf32>
      %33 = vector.multi_reduction <add>, %32, %cst_32 [1, 2] : vector<1x8x128xf32> to vector<1xf32>
      %34 = vector.shape_cast %33 : vector<1xf32> to vector<1x1x1xf32>
      %35 = vector.extract %34[0, 0, 0] : f32 from vector<1x1x1xf32>
      %cst_33 = arith.constant 2.000000e+00 : f32
      %36 = arith.mulf %cst_33, %25 : f32
      %cst_34 = arith.constant 1.000000e-03 : f32
      %37 = arith.addf %36, %cst_34 : f32
      %38 = arith.addf %30, %35 : f32
      %cst_35 = arith.constant 1.000000e-03 : f32
      %39 = arith.addf %38, %cst_35 : f32
      %40 = arith.divf %37, %39 : f32
      %cst_36 = arith.constant 0.000000e+00 : f32
      %41 = vector.broadcast %cst_36 : f32 to vector<1x8x128xf32>
      %42 = vector.broadcast %40 : f32 to vector<1x8x128xf32>
      %43 = arith.addf %41, %42 : vector<1x8x128xf32>
      %c0_37 = arith.constant 0 : index
      %c0_38 = arith.constant 0 : index
      %c0_39 = arith.constant 0 : index
      %44 = vector.load %arg4[%c0_37, %c0_38, %c0_39] : memref<1x8x128xf32, #tpu.memory_space<vmem>>, vector<1x8x128xf32>
      tpu.vector_store %arg4[%c0_37, %c0_38, %c0_39], %43 {strides = array<i32>} : memref<1x8x128xf32, #tpu.memory_space<vmem>>, vector<1x8x128xf32>,
    } else {
    }
    return
  }
  func.func @transform_0(%arg0: i32, %arg1: i32) -> (i32, i32, i32, i32) {
    %c0_i32 = arith.constant 0 : i32
    %c0_i32_0 = arith.constant 0 : i32
    %c0_i32_1 = arith.constant 0 : i32
    return %arg0, %arg1, %c0_i32, %c0_i32_0 : i32, i32, i32, i32
  }
  func.func @transform_1(%arg0: i32, %arg1: i32) -> (i32, i32, i32, i32) {
    %c0_i32 = arith.constant 0 : i32
    %c0_i32_0 = arith.constant 0 : i32
    %c0_i32_1 = arith.constant 0 : i32
    return %arg0, %arg1, %c0_i32, %c0_i32_0 : i32, i32, i32, i32
  }
  func.func @transform_2(%arg0: i32, %arg1: i32) -> (i32, i32, i32) {
    %c0_i32 = arith.constant 0 : i32
    %c0_i32_0 = arith.constant 0 : i32
    %c0_i32_1 = arith.constant 0 : i32
    return %arg0, %c0_i32, %c0_i32_0 : i32, i32, i32
  }
}

</mosaic_0001>

<bundles_post_ra>
// kernel: dice_loss_pallas.1
= control target key start
LH: loop header
LB: loop body
LE: loop exit
PB: predicated region body
PF: predicated region fallthrough
CT: control target
= control target key end

     0   :  { %s418_s9 = smov 0   ;;  %s420_s10 = smov 0   ;;  %s459_s0 = inlined_call_operand.vmem [shape: f32[2,1,8,128], index: 0, kind: input, shape index: {}]   ;;  %s460_s1 = inlined_call_operand.vmem [shape: f32[2,1,8,128], index: 1, kind: input, shape index: {}]   ;;  %s461_s2 = inlined_call_operand.vmem [shape: f32[2,8,128], index: 2, kind: output, shape index: {}]  }
   0x1   :  { %s422_s11 = smov 0  }
   0x2 LB: > { %s24_s12 = sadd.s32 1, %s397_s10  ;;  %p339_p0 = scmp.ge.s32.totalorder %s401_s11, 1  ;;  %s401_s11 = sphi %s422_s11, %s12_s11   ;;  %s397_s10 = sphi %s420_s10, %s463_s10   ;;  %s393_s9 = sphi %s418_s9, %s462_s9  }
   0x3   : > { %p26_p1 = scmp.ge.s32.totalorder %s24_s12, 2  ;;  %p142_p2 = scmp.lt.s32.totalorder %s401_s11, 3 }
   0x5   : > { %s465_s12 = smov (%p26_p1, %s24_s12), 0  ;;  %p143_p3 = pnand %p339_p0, %p142_p2 }
   0x6   : > { %p172_p4 = scmp.lt.s32.totalorder (!%p143_p3), %s393_s9, 1 }
   0x7   : > { %146 = sbr.rel (%p143_p3) target bundleno = 300 (0x12c), region = 28 }
   0xe   : > { %s467_s9 = smov (!%p172_p4, %s393_s9), 1 }
   0xf   : > { %s436_s13 = sshll.u32 %s467_s9, 3 }
  0x10   : > { %s185_s16 = scalar_lea.vmem %s460_s1, %s436_s13  ;;  %s178_s19 = scalar_lea.vmem %s459_s0, %s436_s13 }
  0x11   : > { %v198_v0 = vld [vmem:[%s185_s16] sm:$0xff]  ;;  %s189_s30 = scalar_lea.vmem %s461_s2, %s436_s13 }
  0x12   : > { %v197_v1 = vld [vmem:[%s178_s19] sm:$0xff]  ;;  %236 = vadd.xlane.f32.xlu1 %v198_v0 }
  0x13   : > { %v200_v2 = vmul.f32 %v198_v0, %v197_v1 }
  0x15   : > { %216 = vadd.xlane.f32.xlu0 %v200_v2 }
  0x19   : > { %226 = vadd.xlane.f32.xlu0 %v197_v1 }
  0x9f   : > { %v237_v3 = vpop.xlane.xlu1 %236 }
  0xa0   : > { %v238_v4 = vrot.slane %v237_v3, 4 }
  0xa2   : > { %v217_v5 = vpop.xlane.xlu0 %216  ;;  %v239_v6 = vadd.f32 %v238_v4, %v237_v3 }
  0xa3   : > { %v218_v7 = vrot.slane %v217_v5, 4 }
  0xa4   : > { %v240_v9 = vrot.slane %v239_v6, 2 }
  0xa5   : > { %v219_v8 = vadd.f32 %v218_v7, %v217_v5 }
  0xa6   : > { %v227_v10 = vpop.xlane.xlu0 %226  ;;  %v241_v15 = vadd.f32 %v240_v9, %v239_v6 }
  0xa7   : > { %v220_v11 = vrot.slane %v219_v8, 2  ;;  %v228_v12 = vrot.slane %v227_v10, 4 }
  0xa8   : > { %v242_v20 = vrot.slane %v241_v15, 1 }
  0xa9   : > { %v229_v13 = vadd.f32 %v228_v12, %v227_v10  ;;  %v221_v14 = vadd.f32 %v220_v11, %v219_v8 }
  0xaa   : > { %v243_v23 = vadd.f32 %v242_v20, %v241_v15 }
  0xab   : > { %v230_v16 = vrot.slane %v229_v13, 2  ;;  %v222_v17 = vrot.slane %v221_v14, 1 }
  0xad   : > { %v231_v18 = vadd.f32 %v230_v16, %v229_v13  ;;  %v223_v19 = vadd.f32 %v222_v17, %v221_v14 }
  0xaf   : > { %345 = vpush %v223_v19  ;;  %v232_v21 = vrot.slane %v231_v18, 1 }
  0xb1   : > { %v233_v22 = vadd.f32 %v232_v21, %v231_v18 }
  0xb3   : > { %347 = vpush %v233_v22 }
  0xb4   : > { %349 = vpush %v243_v23 }
  0xe0   : > { %s346_s20 = spop %345 }
  0xe1   : > { %s245_s25 = smul.f32 2.0, %s346_s20 }
  0xe3   : > { %s246_s26 = sadd.f32 0.001, %s245_s25 }
  0xe4   : > { %s348_s21 = spop %347 }
  0xe5   : > { %s350_s22 = spop %349 }
  0xe6   : > { %s247_s23 = sadd.f32 %s350_s22, %s348_s21 }
  0xe8   : > { %s248_s24 = sadd.f32 0.001, %s247_s23 }
  0xea   : > { %v249_v24 = vstv %s248_s24 }
  0xeb   : > { %377 = vrcp.f32 %v249_v24 }
  0xf5   : > { %v378_v25 = vpop.eup %377 }
  0xf6   : > { %351 = vpush %v378_v25 }
 0x127   : > { %s352_s27 = spop %351 }
 0x128   : > { %s252_s3 = smul.f32 %s352_s27, %s246_s26 }
 0x12a   : > { %v253_v26 = vstv %s252_s3 }
 0x12b   : > { %255 = vst [vmem:[%s189_s30] sm:$0xff] %v253_v26 }
 0x12c PF: > { %s12_s11 = sadd.s32 1, %s401_s11   ;;  %s462_s9 = smov %s397_s10 }
 0x12d   : > { %p9_p5 = scmp.ge.s32.totalorder %s12_s11, 4   ;;  %s463_s10 = smov %s465_s12 }
 0x12f   :  { %11 = sbr.rel (!%p9_p5) target bundleno = 2 (0x2), region = 69 }

</bundles_post_ra>
